<compile_context>
chip_gen: v7x
topology: tpu7x:2x2x1
jax: 0.10.0
libtpu: 0.0.40
codegen_flags: <defaults>
</compile_context>

<pallas_src>
import functools
import math

import jax
import jax.numpy as jnp
from jax.experimental import pallas as pl
from jax.experimental.pallas import tpu as pltpu

EPS = 1e-12  # BERT LayerNorm eps


# ----------------------------------------------------------------------------
# Kernel helpers
# ----------------------------------------------------------------------------
def _layer_norm(x, gamma, beta):
    mean = jnp.mean(x, axis=-1, keepdims=True)
    var = jnp.mean((x - mean) ** 2, axis=-1, keepdims=True)
    return (x - mean) * jax.lax.rsqrt(var + EPS) * gamma + beta


def _mm(a, b):
    """MXU matmul: bf16 operands, f32 accumulation."""
    return jnp.dot(a.astype(jnp.bfloat16), b.astype(jnp.bfloat16),
                   preferred_element_type=jnp.float32)


# ----------------------------------------------------------------------------
# Kernels
# ----------------------------------------------------------------------------
def embed_ln_kernel(x_ref, g_ref, b_ref, o_ref):
    # x_ref: (S, H) summed word+pos+type embeddings for one batch element
    o_ref[...] = _layer_norm(x_ref[...], g_ref[...], b_ref[...])


def fused_encoder_kernel(h0_ref, bias_ref,
                         wq_ref, bq_ref, wk_ref, bk_ref, wv_ref, bv_ref,
                         wo_ref, bo_ref, ln1g_ref, ln1b_ref,
                         w1_ref, b1_ref, w2_ref, b2_ref, ln2g_ref, ln2b_ref,
                         o_ref, h_scr, *, num_heads):
    """One grid step = one (batch element, encoder layer) pair.

    grid = (B, L): batch outer ("parallel"), layer inner ("arbitrary").
    The hidden state is carried across the layer axis in VMEM scratch.
    """
    layer = pl.program_id(1)

    @pl.when(layer == 0)
    def _():
        h_scr[...] = h0_ref[...].astype(jnp.float32)

    h = h_scr[...]                                    # (S, H) f32 residual stream
    S, H = h.shape
    hd = H // num_heads
    scale = 1.0 / math.sqrt(hd)
    bias = bias_ref[...]                              # (1, S) additive key mask

    # --- self attention ---
    q = _mm(h, wq_ref[...]) + bq_ref[...]             # (S, H) f32
    k = _mm(h, wk_ref[...]) + bk_ref[...]
    v = _mm(h, wv_ref[...]) + bv_ref[...]

    # split heads: (S, H) -> (num_heads, S, hd), batched over heads
    qh = jnp.swapaxes(q.reshape(S, num_heads, hd), 0, 1)
    kh = jnp.swapaxes(k.reshape(S, num_heads, hd), 0, 1)
    vh = jnp.swapaxes(v.reshape(S, num_heads, hd), 0, 1)

    scores = jnp.einsum('hqd,hkd->hqk',
                        qh.astype(jnp.bfloat16), kh.astype(jnp.bfloat16),
                        preferred_element_type=jnp.float32) * scale + bias
    scores = scores - jnp.max(scores, axis=-1, keepdims=True)
    p = jnp.exp(scores)
    p = p * pl.reciprocal(jnp.sum(p, axis=-1, keepdims=True), approx=True)
    ctx = jnp.einsum('hqk,hkd->hqd',
                     p.astype(jnp.bfloat16), vh.astype(jnp.bfloat16),
                     preferred_element_type=jnp.float32)       # (nh, S, hd)
    ctx = jnp.swapaxes(ctx, 0, 1).reshape(S, H)

    attn_out = _mm(ctx, wo_ref[...]) + bo_ref[...]
    h1 = _layer_norm(h + attn_out, ln1g_ref[...], ln1b_ref[...])

    # --- FFN ---
    inter = _mm(h1, w1_ref[...]) + b1_ref[...]
    # TODO(synk): HF BERT default GELU is exact erf; tanh approx keeps Mosaic
    #             lowering safe (deviation ~1e-3).
    inter = jax.nn.gelu(inter, approximate=True)
    ffn = _mm(inter, w2_ref[...]) + b2_ref[...]
    h_new = _layer_norm(h1 + ffn, ln2g_ref[...], ln2b_ref[...])

    h_scr[...] = h_new
    o_ref[...] = h_new                                # per-layer hidden state out


def pooler_classifier_kernel(cls_ref, wp_ref, bp_ref, wc_ref, bc_ref,
                             pooled_ref, logits_ref):
    cls = cls_ref[...]                                # (B, H) [CLS] hidden states
    pooled = jnp.tanh(
        jnp.dot(cls, wp_ref[...], preferred_element_type=jnp.float32) + bp_ref[...])
    pooled_ref[...] = pooled
    # dropout(pooled) is identity at inference time
    logits_ref[...] = jnp.dot(
        pooled, wc_ref[...], preferred_element_type=jnp.float32) + bc_ref[...]


# ----------------------------------------------------------------------------
# Wrappers (pallas_call plumbing)
# ----------------------------------------------------------------------------
def embed_layer_norm(x, gamma, beta):
    B, S, H = x.shape
    return pl.pallas_call(
        embed_ln_kernel,
        out_shape=jax.ShapeDtypeStruct((B, S, H), jnp.float32),
        grid=(B,),
        in_specs=[
            pl.BlockSpec((None, S, H), lambda b: (b, 0, 0)),
            pl.BlockSpec((1, H), lambda b: (0, 0)),
            pl.BlockSpec((1, H), lambda b: (0, 0)),
        ],
        out_specs=pl.BlockSpec((None, S, H), lambda b: (b, 0, 0)),
        compiler_params=pltpu.CompilerParams(dimension_semantics=("parallel",)),
    )(x, gamma, beta)


def bert_encoder(h, mask_bias, enc, num_heads):
    """Run all L encoder layers in a single fused pallas_call.

    Returns (L, B, S, H): per-layer hidden states (layer L-1 = last hidden)."""
    B, S, H = h.shape
    L = enc["wq"].shape[0]
    I = enc["w1"].shape[2]

    def wspec(shape):
        zeros = (0,) * len(shape)
        return pl.BlockSpec((None,) + shape, lambda b, l, _z=zeros: (l,) + _z)

    in_specs = [
        pl.BlockSpec((None, S, H), lambda b, l: (b, 0, 0)),   # initial hidden
        pl.BlockSpec((None, 1, S), lambda b, l: (b, 0, 0)),   # attention-mask bias
        wspec((H, H)), wspec((1, H)),                         # Wq, bq
        wspec((H, H)), wspec((1, H)),                         # Wk, bk
        wspec((H, H)), wspec((1, H)),                         # Wv, bv
        wspec((H, H)), wspec((1, H)),                         # Wo, bo
        wspec((1, H)), wspec((1, H)),                         # ln1 gamma/beta
        wspec((H, I)), wspec((1, I)),                         # W1, b1
        wspec((I, H)), wspec((1, H)),                         # W2, b2
        wspec((1, H)), wspec((1, H)),                         # ln2 gamma/beta
    ]

    flops = int(B * L * (8 * S * H * H + 4 * S * S * H + 4 * S * H * I))
    transcendentals = int(B * L * (num_heads * S * S + S * I))
    bytes_accessed = int(
        B * L * (4 * H * H + 2 * H * I) * 2          # bf16 weight matrices
        + B * L * (8 * H + 2 * I) * 4                # f32 biases / LN params
        + B * S * H * 4                              # initial hidden in
        + B * L * S * H * 4)                         # per-layer hidden out

    return pl.pallas_call(
        functools.partial(fused_encoder_kernel, num_heads=num_heads),
        out_shape=jax.ShapeDtypeStruct((L, B, S, H), jnp.float32),
        grid=(B, L),
        in_specs=in_specs,
        out_specs=pl.BlockSpec((None, None, S, H), lambda b, l: (l, b, 0, 0)),
        scratch_shapes=[pltpu.VMEM((S, H), jnp.float32)],
        compiler_params=pltpu.CompilerParams(
            dimension_semantics=("parallel", "arbitrary")),
        cost_estimate=pl.CostEstimate(flops=flops,
                                      transcendentals=transcendentals,
                                      bytes_accessed=bytes_accessed),
    )(h, mask_bias,
      enc["wq"], enc["bq"], enc["wk"], enc["bk"], enc["wv"], enc["bv"],
      enc["wo"], enc["bo"], enc["ln1_g"], enc["ln1_b"],
      enc["w1"], enc["b1"], enc["w2"], enc["b2"], enc["ln2_g"], enc["ln2_b"])


def pooler_classifier(cls_hidden, wp, bp, wc, bc):
    B, H = cls_hidden.shape
    C = wc.shape[1]
    Cp = ((C + 127) // 128) * 128                     # lane-dense logits store
    wc_p = jnp.zeros((H, Cp), jnp.float32).at[:, :C].set(wc)
    bc_p = jnp.zeros((1, Cp), jnp.float32).at[:, :C].set(bc)
    pooled, logits_p = pl.pallas_call(
        pooler_classifier_kernel,
        out_shape=(jax.ShapeDtypeStruct((B, H), jnp.float32),
                   jax.ShapeDtypeStruct((B, Cp), jnp.float32)),
        in_specs=[pl.BlockSpec((B, H), lambda: (0, 0)),
                  pl.BlockSpec((H, H), lambda: (0, 0)),
                  pl.BlockSpec((1, H), lambda: (0, 0)),
                  pl.BlockSpec((H, Cp), lambda: (0, 0)),
                  pl.BlockSpec((1, Cp), lambda: (0, 0))],
        out_specs=(pl.BlockSpec((B, H), lambda: (0, 0)),
                   pl.BlockSpec((B, Cp), lambda: (0, 0))),
    )(cls_hidden, wp, bp, wc_p, bc_p)
    return pooled, logits_p[:, :C]


# ----------------------------------------------------------------------------
# Parameter construction + full forward (KOLDModel.forward semantics)
# ----------------------------------------------------------------------------
def init_params(key, *, vocab, max_pos, type_vocab, H, I, L, C):
    ks = iter(jax.random.split(key, 32))

    def n(shape, dtype=jnp.float32, s=0.02):
        return (jax.random.normal(next(ks), shape, jnp.float32) * s).astype(dtype)

    bf16 = jnp.bfloat16
    params = {
        "word_emb": n((vocab, H)),
        "pos_emb": n((max_pos, H)),
        "type_emb": n((type_vocab, H)),
        "emb_ln_g": jnp.ones((1, H), jnp.float32),
        "emb_ln_b": jnp.zeros((1, H), jnp.float32),
        # Per-layer encoder params, stacked along a leading L axis.
        # Weight matrices are bf16 (MXU operands); vectors stay f32.
        "enc": {
            "wq": n((L, H, H), bf16), "bq": jnp.zeros((L, 1, H), jnp.float32),
            "wk": n((L, H, H), bf16), "bk": jnp.zeros((L, 1, H), jnp.float32),
            "wv": n((L, H, H), bf16), "bv": jnp.zeros((L, 1, H), jnp.float32),
            "wo": n((L, H, H), bf16), "bo": jnp.zeros((L, 1, H), jnp.float32),
            "ln1_g": jnp.ones((L, 1, H), jnp.float32),
            "ln1_b": jnp.zeros((L, 1, H), jnp.float32),
            "w1": n((L, H, I), bf16), "b1": jnp.zeros((L, 1, I), jnp.float32),
            "w2": n((L, I, H), bf16), "b2": jnp.zeros((L, 1, H), jnp.float32),
            "ln2_g": jnp.ones((L, 1, H), jnp.float32),
            "ln2_b": jnp.zeros((L, 1, H), jnp.float32),
        },
        "pooler_w": n((H, H)),
        "pooler_b": jnp.zeros((1, H), jnp.float32),
        "cls_w": n((H, C)),
        "cls_b": jnp.zeros((1, C), jnp.float32),
    }
    return params


def kold_model_forward(params, inputs, *, num_heads):
    input_ids = inputs["input_ids"]                 # (B, S) int32
    token_type_ids = inputs["token_type_ids"]       # (B, S) int32
    attention_mask = inputs["attention_mask"]       # (B, S) float32 (1 = keep)
    B, S = input_ids.shape

    # --- embeddings (gather = glue, LayerNorm = Pallas) ---
    pos_ids = jnp.arange(S, dtype=jnp.int32)
    emb = (jnp.take(params["word_emb"], input_ids, axis=0)
           + jnp.take(params["pos_emb"], pos_ids, axis=0)[None, :, :]
           + jnp.take(params["type_emb"], token_type_ids, axis=0))
    h = embed_layer_norm(emb, params["emb_ln_g"], params["emb_ln_b"])

    # additive attention-mask bias, shape (B, 1, S)
    mask_bias = (1.0 - attention_mask.astype(jnp.float32))[:, None, :] * -1e9

    # --- fused encoder stack ---
    all_h = bert_encoder(h, mask_bias, params["enc"], num_heads)   # (L, B, S, H)
    L = all_h.shape[0]
    hidden_states = (h,) + tuple(all_h[l] for l in range(L))       # output_hidden_states=True
    last_hidden_state = all_h[L - 1]

    # --- pooler + classifier ---
    cls_hidden = last_hidden_state[:, 0, :]         # [CLS] token (glue slice)
    pooled_output, logits = pooler_classifier(
        cls_hidden, params["pooler_w"], params["pooler_b"],
        params["cls_w"], params["cls_b"])

    outputs = {
        "last_hidden_state": last_hidden_state,
        "pooler_output": pooled_output,
        "hidden_states": hidden_states,
    }
    # nn.Dropout is identity in eval mode; logits = classifier(dropout(pooled))
    return outputs, logits


# ----------------------------------------------------------------------------
if __name__ == "__main__":
    # Small synthetic config (mirrors KOLDModel.__init__ shapes):
    #   hidden_size=32, num_hidden_layers=2, num_attention_heads=2,
    #   intermediate_size=64, vocab_size=100, max_position_embeddings=16,
    #   type_vocab_size=2, level_N_label_num=4 -> class_num=4
    B, S = 2, 8
    VOCAB, MAX_POS, TYPE_VOCAB = 100, 16, 2
    H, I, L, NUM_HEADS, CLASS_NUM = 32, 64, 2, 2, 4

    key = jax.random.PRNGKey(0)
    pkey, ikey = jax.random.split(key)
    params = init_params(pkey, vocab=VOCAB, max_pos=MAX_POS, type_vocab=TYPE_VOCAB,
                         H=H, I=I, L=L, C=CLASS_NUM)

    inputs = {
        "input_ids": jax.random.randint(ikey, (B, S), 0, VOCAB, dtype=jnp.int32),
        "token_type_ids": jnp.zeros((B, S), jnp.int32),
        "attention_mask": jnp.ones((B, S), jnp.float32),
    }

    outputs, logits = kold_model_forward(params, inputs, num_heads=NUM_HEADS)
    jax.block_until_ready(logits)
    jax.block_until_ready(outputs["pooler_output"])

    assert logits.shape == (B, CLASS_NUM)
    assert outputs["pooler_output"].shape == (B, H)
    assert outputs["last_hidden_state"].shape == (B, S, H)
    assert len(outputs["hidden_states"]) == L + 1
    print("KERNEL_OK")
</pallas_src>

<mosaic_0001>
module attributes {stable_mosaic.version = 11 : i64} {
  func.func @embed_ln_kernel(%arg0: i32, %arg1: memref<1x8x32xf32, #tpu.memory_space<vmem>>, %arg2: memref<1x32xf32, #tpu.memory_space<vmem>>, %arg3: memref<1x32xf32, #tpu.memory_space<vmem>>, %arg4: memref<1x8x32xf32, #tpu.memory_space<vmem>>) attributes {dimension_semantics = [#tpu.dimension_semantics<parallel>], iteration_bounds = array<i64: 2>, scalar_prefetch = 0 : i64, scratch_operands = 0 : i64, tpu.core_type = #tpu.core_type<tc>, window_params = [{transform_indices = @transform_0, window_bounds = array<i64: 1, 8, 32>}, {pipeline_mode = #tpu.pipeline_mode<synchronous>, transform_indices = @transform_1, window_bounds = array<i64: 1, 32>}, {pipeline_mode = #tpu.pipeline_mode<synchronous>, transform_indices = @transform_2, window_bounds = array<i64: 1, 32>}, {transform_indices = @transform_3, window_bounds = array<i64: 1, 8, 32>}]} {
    %c0 = arith.constant 0 : index
    %c0_0 = arith.constant 0 : index
    %c0_1 = arith.constant 0 : index
    %0 = vector.load %arg1[%c0, %c0_0, %c0_1] : memref<1x8x32xf32, #tpu.memory_space<vmem>>, vector<1x8x32xf32>
    %1 = vector.shape_cast %0 : vector<1x8x32xf32> to vector<8x32xf32>
    %c0_2 = arith.constant 0 : index
    %c0_3 = arith.constant 0 : index
    %2 = vector.load %arg2[%c0_2, %c0_3] : memref<1x32xf32, #tpu.memory_space<vmem>>, vector<1x32xf32>
    %c0_4 = arith.constant 0 : index
    %c0_5 = arith.constant 0 : index
    %3 = vector.load %arg3[%c0_4, %c0_5] : memref<1x32xf32, #tpu.memory_space<vmem>>, vector<1x32xf32>
    %cst = arith.constant dense<0.000000e+00> : vector<8xf32>
    %4 = vector.multi_reduction <add>, %1, %cst [1] : vector<8x32xf32> to vector<8xf32>
    %5 = vector.shape_cast %4 : vector<8xf32> to vector<8x1xf32>
    %cst_6 = arith.constant 3.200000e+01 : f32
    %6 = vector.broadcast %cst_6 : f32 to vector<8x1xf32>
    %7 = arith.divf %5, %6 : vector<8x1xf32>
    %8 = vector.broadcast %7 : vector<8x1xf32> to vector<8x32xf32>
    %9 = arith.subf %1, %8 : vector<8x32xf32>
    %10 = arith.mulf %9, %9 : vector<8x32xf32>
    %cst_7 = arith.constant dense<0.000000e+00> : vector<8xf32>
    %11 = vector.multi_reduction <add>, %10, %cst_7 [1] : vector<8x32xf32> to vector<8xf32>
    %12 = vector.shape_cast %11 : vector<8xf32> to vector<8x1xf32>
    %cst_8 = arith.constant 3.200000e+01 : f32
    %13 = vector.broadcast %cst_8 : f32 to vector<8x1xf32>
    %14 = arith.divf %12, %13 : vector<8x1xf32>
    %15 = vector.broadcast %7 : vector<8x1xf32> to vector<8x32xf32>
    %16 = arith.subf %1, %15 : vector<8x32xf32>
    %cst_9 = arith.constant 9.99999996E-13 : f32
    %17 = vector.broadcast %cst_9 : f32 to vector<8x1xf32>
    %18 = arith.addf %14, %17 : vector<8x1xf32>
    %19 = math.rsqrt %18 : vector<8x1xf32>
    %20 = vector.broadcast %19 : vector<8x1xf32> to vector<8x32xf32>
    %21 = arith.mulf %16, %20 : vector<8x32xf32>
    %22 = vector.broadcast %2 : vector<1x32xf32> to vector<8x32xf32>
    %23 = arith.mulf %21, %22 : vector<8x32xf32>
    %24 = vector.broadcast %3 : vector<1x32xf32> to vector<8x32xf32>
    %25 = arith.addf %23, %24 : vector<8x32xf32>
    %c0_10 = arith.constant 0 : index
    %c0_11 = arith.constant 0 : index
    %c0_12 = arith.constant 0 : index
    %26 = vector.load %arg4[%c0_10, %c0_11, %c0_12] : memref<1x8x32xf32, #tpu.memory_space<vmem>>, vector<1x8x32xf32>
    %27 = vector.shape_cast %26 : vector<1x8x32xf32> to vector<8x32xf32>
    %28 = vector.shape_cast %25 : vector<8x32xf32> to vector<1x8x32xf32>
    tpu.vector_store %arg4[%c0_10, %c0_11, %c0_12], %28 {strides = array<i32>} : memref<1x8x32xf32, #tpu.memory_space<vmem>>, vector<1x8x32xf32>,
    return
  }
  func.func @transform_0(%arg0: i32) -> (i32, i32, i32) {
    %c0_i32 = arith.constant 0 : i32
    %c0_i32_0 = arith.constant 0 : i32
    %c0_i32_1 = arith.constant 0 : i32
    return %arg0, %c0_i32, %c0_i32_0 : i32, i32, i32
  }
  func.func @transform_1(%arg0: i32) -> (i32, i32) {
    %c0_i32 = arith.constant 0 : i32
    %c0_i32_0 = arith.constant 0 : i32
    %c0_i32_1 = arith.constant 0 : i32
    return %c0_i32, %c0_i32_0 : i32, i32
  }
  func.func @transform_2(%arg0: i32) -> (i32, i32) {
    %c0_i32 = arith.constant 0 : i32
    %c0_i32_0 = arith.constant 0 : i32
    %c0_i32_1 = arith.constant 0 : i32
    return %c0_i32, %c0_i32_0 : i32, i32
  }
  func.func @transform_3(%arg0: i32) -> (i32, i32, i32) {
    %c0_i32 = arith.constant 0 : i32
    %c0_i32_0 = arith.constant 0 : i32
    %c0_i32_1 = arith.constant 0 : i32
    return %arg0, %c0_i32, %c0_i32_0 : i32, i32, i32
  }
}

</mosaic_0001>

<bundles_post_ra>
// kernel: tpu_custom_call.1
= control target key start
LH: loop header
LB: loop body
LE: loop exit
PB: predicated region body
PF: predicated region fallthrough
CT: control target
= control target key end

     0   :  { %8 = vsyncpa [#allocation3], 0  ;;  %s655_s0 = inlined_call_operand.hbm [shape: f32[2,8,32], index: 0, kind: input, shape index: {}]   ;;  %s656_s1 = inlined_call_operand.vmem [shape: f32[1,32], index: 1, kind: input, shape index: {}]   ;;  %s657_s2 = inlined_call_operand.vmem [shape: f32[1,32], index: 2, kind: input, shape index: {}]   ;;  %s658_s3 = inlined_call_operand.hbm [shape: f32[2,8,32], index: 3, kind: output, shape index: {}]  }
   0x1   :  { %10 = vsyncpa [#allocation3 + $0x1], 0 }
   0x2   :  { %11 = vsyncpa [#allocation4], 0 }
   0x3   :  { %13 = vsyncpa [#allocation4 + $0x1], 0  ;;  %s485_s12 = smov 0   ;;  %s487_s13 = smov 0  }
   0x4   :  { %s489_s14 = smov 0   ;;  %s491_s15 = smov 0  }
   0x5 LB: > { %s506_s16 = sadd.s32 4294967295, %s461_s15   ;;  %s303_s17 = sadd.s32 4294967294, %s461_s15   ;;  %s461_s15 = sphi %s491_s15, %s673_s15   ;;  %s457_s14 = sphi %s489_s14, %s672_s14   ;;  %s453_s13 = sphi %s487_s13, %s671_s13   ;;  %s449_s12 = sphi %s485_s12, %s670_s12  }
   0x6   : > { %s510_s18 = sadd.s32 1, %s461_s15   ;;  %s26_s19 = sadd.s32 1, %s457_s14 }
   0x7   : > { %s23_s20 = ssub.s32 %s461_s15, %s510_s18  ;;  %p33_p0 = scmp.ne.s32.totalorder %s457_s14, %s453_s13 }
   0x8   : > { %p24_p1 = scmp.eq.s32.totalorder %s23_s20, 0  ;;  %p34_p2 = scmp.eq.s32.totalorder %s461_s15, 0 }
   0x9   : > { %p39_p3 = scmp.ne.s32.totalorder %s453_s13, %s449_s12  ;;  %p40_p4 = scmp.eq.s32.totalorder %s506_s16, 0 }
   0xa   : > { %s522_s21 = scalar_select %p24_p1, %s457_s14, %s26_s19  }
   0xb   : > { %p524_p5 = por %p34_p2, %p33_p0  ;;  %p528_p6 = por %p40_p4, %p39_p3 }
   0xc   : > { %p105_p7 = scmp.eq.s32.totalorder %s506_s16, 1  ;;  %p111_p8 = scmp.eq.s32.totalorder %s303_s17, 1 }
   0xd   : > { %p329_p10 = scmp.lt.s32.totalorder %s461_s15, 2  ;;  %s137_s26 = sand.u32 1, %s457_s14  }
   0xe   : > { %p535_p11 = por %p105_p7, %p33_p0  ;;  %p539_p12 = por %p111_p8, %p39_p3 }
   0xf   : > { %s307_s27 = sshll.u32 %s461_s15, 7  ;;  %s306_s28 = sshll.u32 %s137_s26, 3 }
  0x10   : > { %s662_s24 = scalar_select %p535_p11, 1, 0 }
  0x11   : > { %s663_s25 = scalar_select %p539_p12, 1, 0 }
  0x12   : > { %s548_s4 = scalar_lea.hbm %s655_s0, %s307_s27  ;;  %s141_s5 = scalar_lea.vmem [#allocation2], %s306_s28 }
  0x13   : > { %s148_s6 = sshll.u32 %s141_s5, 4  ;;  %p552_p13 = pnand %p329_p10, %p524_p5  ;;  %s556_s6 = int_to_ptr.vmem [resolvable:$true] %s148_s6 }
  0x14   : > { %s138_s8 = scalar_lea.sflag [#allocation3], %s137_s26  ;;  %s365_s9 = scalar_lea.hbm %s548_s4, 128 }
  0x15   : > { %p366_p2 = scmp.ne.s32.totalorder %s548_s4, %s365_s9  ;;  %p367_p3 = pneg %p552_p13 }
  0x16   : > { %s370_s17 = scalar_lea.hbm %s655_s0, 256  ;;  %p371_p5 = scmp.lt.u32.totalorder %s548_s4, %s655_s0 }
  0x17   : > { %p368_p4 = pnand %p367_p3, %p366_p2  ;;  %p372_p8 = scmp.lt.u32.totalorder %s370_s17, %s365_s9 }
  0x18   : > { %p374_p9 = scmp.lt.u32.totalorder %s365_s9, %s548_s4 }
  0x19   : > { %p369_p7 = pneg %p368_p4  ;;  %p373_p10 = por %p372_p8, %p371_p5 }
  0x1b   : > { %p375_p0 = por %p374_p9, %p373_p10 }
  0x1d   : > { %p376_p1 = pnand %p375_p0, %p369_p7 }
  0x1f   : > { %379 = shalt.err (!%p376_p1)
}
  0x20   : > { %s380_s22 = scalar_lea.vmem %s556_s6, 128  ;;  %s463_s26 = smov [#allocation2]  }
  0x21   : > { %p381_p2 = scmp.ne.s32.totalorder %s556_s6, %s380_s22  ;;  %s385_s27 = sshll.u32 %s463_s26, 4  ;;  %s386_s27 = int_to_ptr.vmem [resolvable:$false] %s385_s27 }
  0x22   : > { %s387_s28 = scalar_lea.vmem %s386_s27, 256  ;;  %p388_p11 = scmp.lt.s32.totalorder %s556_s6, %s386_s27 }
  0x23   : > { %p383_p4 = pnand %p381_p2, %p367_p3  ;;  %p389_p5 = scmp.lt.s32.totalorder %s387_s28, %s380_s22 }
  0x25   : > { %p384_p12 = pneg %p383_p4  ;;  %p390_p8 = por %p389_p5, %p388_p11 }
  0x27   : > { %p391_p9 = pnand %p390_p8, %p384_p12 }
  0x29   : > { %394 = shalt.err (!%p391_p9)
}
  0x2a   : > { %324 = dma.hbm_to_vmem [thread:$0]  (!%p552_p13), %s548_s4, 128, %s556_s6, %s138_s8  }
  0x2b   : > { %p665_p0 = scmp.lt.s32.totalorder %s461_s15, 3  ;;  %p666_p1 = scmp.ge.s32.totalorder %s461_s15, 1 }
  0x2d   : > { %p154_p3 = pnand %p666_p1, %p665_p0 }
  0x2e   : > { %s590_s29 = sand.u32 (!%p154_p3), 1, %s453_s13  }
  0x2f   : > { %157 = sbr.rel (%p154_p3) target bundleno = 383 (0x17f), region = 32  ;;  %s309_s30 = sshll.u32 (!%p154_p3), %s590_s29, 3 }
  0x30   : > { %s160_s5 = scalar_lea.sflag (!%p154_p3), [#allocation3], %s590_s29  ;;  %s163_s9 = scalar_lea.vmem (!%p154_p3), [#allocation2], %s309_s30 }
  0x36   : > { %440 = dma.done.wait (%p528_p6), %s160_s5, 128  }
  0x37   : > { %442 = vsyncadd (%p528_p6), %s160_s5, 4294967168  ;;  %vm189_vm0 = vcmask 261120   ;;  %v186_v0 = vld [vmem:[%s163_s9] sm:$0xff]  ;;  %s314_s8 = sshll.u32 %s506_s16, 7  ;;  %s185_s10 = scalar_lea.vmem [#allocation5], %s309_s30 }
  0x38   : > { %v190_v1 = vsel %vm189_vm0, %v186_v0, 0.0  ;;  %v311_v11 = vld [vmem:[%s656_s1] ss:$0 sm:$0xff]  ;;  %s233_s11 = sshll.u32 %s185_s10, 4  ;;  %s610_s20 = scalar_lea.hbm %s658_s3, %s314_s8  ;;  %s612_s11 = int_to_ptr.vmem [resolvable:$true] %s233_s11 }
  0x39   : > { %191 = vadd.xlane.f32.xlu0 %v190_v1  ;;  %v312_v13 = vld [vmem:[%s657_s2] ss:$0 sm:$0xff]  ;;  %s220_s22 = scalar_lea.sflag [#allocation4], %s590_s29  ;;  %s395_s26 = scalar_lea.vmem %s612_s11, 128 }
  0x3a   : > { %p396_p6 = scmp.ne.s32.totalorder %s612_s11, %s395_s26  ;;  %p667_p11 = scmp.ne.s32.totalorder %s662_s24, 0 }
  0x3b   : > { %s464_s16 = smov [#allocation5]  }
  0x3c   : > { %p397_p12 = pnand %p396_p6, %p667_p11  ;;  %s399_s27 = sshll.u32 %s464_s16, 4  ;;  %s400_s27 = int_to_ptr.vmem [resolvable:$false] %s399_s27 }
  0x3d   : > { %s401_s28 = scalar_lea.vmem %s400_s27, 256  ;;  %p402_p7 = scmp.lt.s32.totalorder %s612_s11, %s400_s27 }
  0x3e   : > { %p398_p13 = pneg %p397_p12  ;;  %p403_p10 = scmp.lt.s32.totalorder %s401_s28, %s395_s26 }
  0x40   : > { %p404_p2 = por %p403_p10, %p402_p7 }
  0x42   : > { %p405_p4 = pnand %p404_p2, %p398_p13 }
  0xc6   : > { %v192_v2 = vpop.xlane.xlu0 %191 }
  0xc7   : > { %v194_v3 = vmul.f32 0.03125, %v192_v2 }
  0xc9   : > { %v195_v4 = vsub.f32 %v186_v0, %v194_v3 }
  0xcb   : > { %v196_v5 = vmul.f32 %v195_v4, %v195_v4 }
  0xcd   : > { %v197_v6 = vsel %vm189_vm0, %v196_v5, 0.0 }
  0xce   : > { %198 = vadd.xlane.f32.xlu0 %v197_v6 }
 0x15b   : > { %v199_v7 = vpop.xlane.xlu0 %198 }
 0x15c   : > { %v200_v8 = vmul.f32 0.03125, %v199_v7 }
 0x15e   : > { %v201_v9 = vadd.f32 1e-12, %v200_v8 }
 0x160   : > { %363 = vrsqrt.f32 %v201_v9 }
 0x16a   : > { %v364_v10 = vpop.eup %363 }
 0x16b   : > { %v203_v12 = vmul.f32 %v364_v10, %v195_v4 }
 0x16d   : > { %v210_v14 = vmul.f32 %v311_v11, %v203_v12 }
 0x16f   : > { %v217_v15 = vadd.f32 %v312_v13, %v210_v14 }
 0x171   : > { %218 = vst.msk [vmem:[%s185_s10] sm:$0xff] %vm189_vm0, %v217_v15 }
 0x172   : > { %408 = shalt.err (!%p405_p4)
}
 0x173   : > { %s409_s29 = scalar_lea.hbm %s610_s20, 128  ;;  %s413_s9 = scalar_lea.hbm %s658_s3, 256 }
 0x174   : > { %p410_p5 = scmp.ne.s32.totalorder %s610_s20, %s409_s29  ;;  %p414_p0 = scmp.lt.u32.totalorder %s610_s20, %s658_s3 }
 0x175   : > { %p415_p1 = scmp.lt.u32.totalorder %s413_s9, %s409_s29  ;;  %p417_p6 = scmp.lt.u32.totalorder %s409_s29, %s610_s20 }
 0x176   : > { %p411_p8 = pnand %p410_p5, %p667_p11 }
 0x177   : > { %p416_p3 = por %p415_p1, %p414_p0 }
 0x178   : > { %p412_p9 = pneg %p411_p8 }
 0x179   : > { %p418_p12 = por %p417_p6, %p416_p3 }
 0x17b   : > { %p419_p13 = pnand %p418_p12, %p412_p9 }
 0x17d   : > { %422 = shalt.err (!%p419_p13)
}
 0x17e   : > { %319 = dma.vmem_to_hbm [thread:$0]  (%p667_p11), %s612_s11, 128, %s610_s20, %s220_s22  }
 0x17f PF: > { %s245_s6 = sand.u32 1, %s449_s12   ;;  %p668_p7 = scmp.ne.s32.totalorder %s663_s25, 0 }
 0x180   : > { %p669_p10 = scmp.ge.s32.totalorder %s461_s15, 2  ;;  %s246_s7 = scalar_lea.sflag [#allocation4], %s245_s6 }
 0x182   : > { %p326_p2 = pnand %p669_p10, %p668_p7 }
 0x184   : > { %444 = dma.done.wait (!%p326_p2), %s246_s7, 128  }
 0x185   : > { %446 = vsyncadd (!%p326_p2), %s246_s7, 4294967168  ;;  %p16_p4 = scmp.ge.s32.totalorder %s510_s18, 4   ;;  %s670_s12 = smov %s453_s13 }
 0x186   : > { %s671_s13 = smov %s457_s14  ;;  %s672_s14 = smov %s522_s21 }
 0x187   : > { %s673_s15 = smov %s510_s18  ;;  %18 = sbr.rel (!%p16_p4) target bundleno = 5 (0x5), region = 77 }
 0x18e   :  { %251 = vsyncpa [#allocation3], 1 }
 0x18f   :  { %253 = vsyncpa [#allocation3 + $0x1], 1 }
 0x190   :  { %254 = vsyncpa [#allocation4], 1 }
 0x191   :  { %256 = vsyncpa [#allocation4 + $0x1], 1 }

</bundles_post_ra>
